<compile_context>
chip_gen: v7x
topology: tpu7x:2x2x1
jax: 0.10.0
libtpu: 0.0.40
codegen_flags: <defaults>
</compile_context>

<pallas_src>
import functools

import numpy as np
import jax
import jax.numpy as jnp
from jax.experimental import pallas as pl
from jax.experimental.pallas import tpu as pltpu


# ----------------------------------------------------------------------------
# Parameter setup (plain numpy, deterministic) -- mirrors torch module __init__
# ----------------------------------------------------------------------------
def cosine_beta_schedule_discrete(timesteps, s=0.008):
    steps = timesteps + 2
    x = np.linspace(0, steps, steps)
    alphas_cumprod = np.cos(0.5 * np.pi * (x / steps + s) / (1 + s)) ** 2
    alphas_cumprod = alphas_cumprod / alphas_cumprod[0]
    alphas = alphas_cumprod[1:] / alphas_cumprod[:-1]
    betas = 1 - alphas
    return betas.squeeze()


def custom_beta_schedule_discrete(timesteps, average_num_nodes=50, s=0.008):
    betas = cosine_beta_schedule_discrete(timesteps, s)
    assert timesteps >= 100
    p = 4 / 5
    num_edges = average_num_nodes * (average_num_nodes - 1) / 2
    updates_per_graph = 1.2
    beta_first = updates_per_graph / (p * num_edges)
    betas = np.array(betas)
    betas[betas < beta_first] = beta_first
    return betas


# ----------------------------------------------------------------------------
# Pallas kernel: closed-form cosine-schedule beta lookup (elementwise)
# ----------------------------------------------------------------------------
def _beta_kernel(t_ref, o_ref, *, scale, n, c, sin_delta, beta_floor):
    """o = betas[clip(round(t * scale), 0, n-1)], computed in closed form.

    n = timesteps + 1 (table length), c = 0.5*pi/(n*(1+s)), sin_delta = sin(c).
    """
    t = t_ref[...]                                              # (R, L) f32
    idx = jnp.round(t * jnp.float32(scale))                     # exact ints in f32
    idx = jnp.clip(idx, 0.0, jnp.float32(n - 1))                # [0, timesteps]

    m = jnp.float32(n) - idx                                    # n - i  in [1, n]
    phi = jnp.float32(c) * m                                    # pi/2 - theta_i
    s_phi = jnp.sin(phi)                                        # = cos(theta_i)
    s_sum = jnp.sin(jnp.float32(c) * (2.0 * m - 1.0))           # = sin(theta_i+theta_{i+1})
    beta = s_sum * jnp.float32(sin_delta) / (s_phi * s_phi)

    if beta_floor is not None:                                  # 'custom' schedule only
        beta = jnp.maximum(beta, jnp.float32(beta_floor))
    o_ref[...] = beta


# ----------------------------------------------------------------------------
# Wrapper
# ----------------------------------------------------------------------------
class NoiseScheduleDiscretePallas:
    _LANES = 512        # lane width of the dense 2-D batch layout
    _ROW_BLOCK = 128    # rows per grid step in the large-batch path (256 KB/step)

    def __init__(self, noise_schedule, timesteps, s=0.008):
        self.timesteps = timesteps
        self._s = float(s)

        if noise_schedule == "cosine":
            betas64 = cosine_beta_schedule_discrete(timesteps, s)
            self._beta_floor = None
        elif noise_schedule == "custom":
            betas64 = custom_beta_schedule_discrete(timesteps, s=s)
            p = 4 / 5
            num_edges = 50 * 49 / 2
            self._beta_floor = float(1.2 / (p * num_edges))
        else:
            raise NotImplementedError(noise_schedule)

        # Closed-form constants (float64 on host, cast to f32 inside the kernel).
        n = timesteps + 1                          # number of betas entries
        self._n = n
        self._c = float(0.5 * np.pi / (n * (1.0 + s)))
        self._sin_delta = float(np.sin(self._c))

        # Host-side float32 table (reference / parity with the torch buffer).
        self.betas_np = betas64.astype(np.float32)                     # (T+1,)
        alphas = 1.0 - np.clip(self.betas_np, 0.0, 0.9999)
        self.alphas_bar_np = np.exp(np.cumsum(np.log(alphas)))         # parity only

    # -- internal: run the kernel on a dense (R, LANES) f32 block ------------
    def _run(self, t2d, scale):
        rows, lanes = t2d.shape
        kernel = functools.partial(
            _beta_kernel,
            scale=scale, n=self._n, c=self._c,
            sin_delta=self._sin_delta, beta_floor=self._beta_floor,
        )
        if rows <= self._ROW_BLOCK:
            # Gridless: single full-array VMEM block (<= 256 KB per array).
            return pl.pallas_call(
                kernel,
                out_shape=jax.ShapeDtypeStruct((rows, lanes), jnp.float32),
                in_specs=[pl.BlockSpec(memory_space=pltpu.MemorySpace.VMEM)],
                out_specs=pl.BlockSpec(memory_space=pltpu.MemorySpace.VMEM),
            )(t2d)
        # Large batch: 1-D parallel grid over row blocks (both TCs on v7x).
        tr = self._ROW_BLOCK
        return pl.pallas_call(
            kernel,
            out_shape=jax.ShapeDtypeStruct((rows, lanes), jnp.float32),
            grid=(rows // tr,),
            in_specs=[pl.BlockSpec((tr, lanes), lambda i: (i, 0))],
            out_specs=pl.BlockSpec((tr, lanes), lambda i: (i, 0)),
            compiler_params=pltpu.CompilerParams(
                dimension_semantics=("parallel",)
            ),
        )(t2d)

    def forward(self, t_normalized=None, t_int=None):
        """Same semantics as the torch module: betas[round(t_normalized * T)]
        (or betas[t_int] if t_int is given). Any input shape; f32 output."""
        assert int(t_normalized is None) + int(t_int is None) == 1
        if t_int is None:
            t = jnp.asarray(t_normalized, dtype=jnp.float32)
            scale = float(self.timesteps)
        else:
            t = jnp.asarray(t_int, dtype=jnp.float32)
            scale = 1.0

        orig_shape = t.shape
        flat = t.reshape(-1)
        b = flat.shape[0]

        # Dense 2-D layout: (rows, LANES) with rows a multiple of 8 (and of the
        # row block when gridded) -> full-vreg, unmasked loads/stores.
        lanes = self._LANES
        rows = -(-b // lanes)
        rows = max(8, ((rows + 7) // 8) * 8)
        if rows > self._ROW_BLOCK:
            rb = self._ROW_BLOCK
            rows = ((rows + rb - 1) // rb) * rb
        total = rows * lanes

        padded = jnp.pad(flat, (0, total - b))
        t2d = padded.reshape(rows, lanes)

        out2d = self._run(t2d, scale)
        return out2d.reshape(-1)[:b].reshape(orig_shape)


# ----------------------------------------------------------------------------
# Main
# ----------------------------------------------------------------------------
if __name__ == "__main__":
    timesteps = 500
    batch = 8

    sched = NoiseScheduleDiscretePallas("cosine", timesteps)
    key = jax.random.PRNGKey(0)

    # --- small batch (gridless path), same shape as the torch usage ---------
    t_normalized = jax.random.uniform(key, (batch, 1), dtype=jnp.float32)
    out = jax.block_until_ready(sched.forward(t_normalized=t_normalized))

    t_np = np.asarray(t_normalized)
    idx_ref = np.round(t_np * np.float32(timesteps)).astype(np.int64)
    ref = sched.betas_np[idx_ref.reshape(-1)].reshape(t_np.shape)
    # Closed-form f32 vs float64-derived table: expect agreement to a few ulps.
    np.testing.assert_allclose(np.asarray(out), ref, rtol=1e-4, atol=1e-6)

    # --- larger batch (tiled parallel-grid path) -----------------------------
    key2 = jax.random.PRNGKey(1)
    t_big = jax.random.uniform(key2, (67584,), dtype=jnp.float32)
    out_big = jax.block_until_ready(sched.forward(t_normalized=t_big))

    t_big_np = np.asarray(t_big)
    idx_big = np.round(t_big_np * np.float32(timesteps)).astype(np.int64)
    ref_big = sched.betas_np[idx_big]
    np.testing.assert_allclose(np.asarray(out_big), ref_big, rtol=1e-4, atol=1e-6)

    print("KERNEL_OK")
</pallas_src>

<mosaic_0001>
module attributes {stable_mosaic.version = 11 : i64} {
  func.func @_beta_kernel(%arg0: memref<8x512xf32, #tpu.memory_space<vmem>>, %arg1: memref<8x512xf32, #tpu.memory_space<vmem>>) attributes {dimension_semantics = [], scalar_prefetch = 0 : i64, scratch_operands = 0 : i64, tpu.core_type = #tpu.core_type<tc>} {
    %c0 = arith.constant 0 : index
    %c0_0 = arith.constant 0 : index
    %0 = vector.load %arg0[%c0, %c0_0] : memref<8x512xf32, #tpu.memory_space<vmem>>, vector<8x512xf32>
    %cst = arith.constant 5.000000e+02 : f32
    %1 = vector.broadcast %cst : f32 to vector<8x512xf32>
    %2 = arith.mulf %0, %1 : vector<8x512xf32>
    %3 = math.roundeven %2 : vector<8x512xf32>
    %cst_1 = arith.constant 0.000000e+00 : f32
    %cst_2 = arith.constant 5.000000e+02 : f32
    %4 = vector.broadcast %cst_1 : f32 to vector<8x512xf32>
    %5 = arith.maximumf %4, %3 : vector<8x512xf32>
    %6 = vector.broadcast %cst_2 : f32 to vector<8x512xf32>
    %7 = arith.minimumf %6, %5 : vector<8x512xf32>
    %cst_3 = arith.constant 5.010000e+02 : f32
    %8 = vector.broadcast %cst_3 : f32 to vector<8x512xf32>
    %9 = arith.subf %8, %7 : vector<8x512xf32>
    %cst_4 = arith.constant 0.00311043859 : f32
    %10 = vector.broadcast %cst_4 : f32 to vector<8x512xf32>
    %11 = arith.mulf %10, %9 : vector<8x512xf32>
    %12 = math.sin %11 : vector<8x512xf32>
    %cst_5 = arith.constant 2.000000e+00 : f32
    %13 = vector.broadcast %cst_5 : f32 to vector<8x512xf32>
    %14 = arith.mulf %13, %9 : vector<8x512xf32>
    %cst_6 = arith.constant 1.000000e+00 : f32
    %15 = vector.broadcast %cst_6 : f32 to vector<8x512xf32>
    %16 = arith.subf %14, %15 : vector<8x512xf32>
    %cst_7 = arith.constant 0.00311043859 : f32
    %17 = vector.broadcast %cst_7 : f32 to vector<8x512xf32>
    %18 = arith.mulf %17, %16 : vector<8x512xf32>
    %19 = math.sin %18 : vector<8x512xf32>
    %cst_8 = arith.constant 0.00311043346 : f32
    %20 = vector.broadcast %cst_8 : f32 to vector<8x512xf32>
    %21 = arith.mulf %19, %20 : vector<8x512xf32>
    %22 = arith.mulf %12, %12 : vector<8x512xf32>
    %23 = arith.divf %21, %22 : vector<8x512xf32>
    %c0_9 = arith.constant 0 : index
    %c0_10 = arith.constant 0 : index
    %24 = vector.load %arg1[%c0_9, %c0_10] : memref<8x512xf32, #tpu.memory_space<vmem>>, vector<8x512xf32>
    tpu.vector_store %arg1[%c0_9, %c0_10], %23 {strides = array<i32>} : memref<8x512xf32, #tpu.memory_space<vmem>>, vector<8x512xf32>,
    return
  }
}

</mosaic_0001>

<bundles_post_ra>
// kernel: tpu_custom_call.1
= control target key start
LH: loop header
LB: loop body
LE: loop exit
PB: predicated region body
PF: predicated region fallthrough
CT: control target
= control target key end

     0   :  { %6 = vsyncpa [#allocation3], 0  ;;  %s1821_s0 = inlined_call_operand.hbm [shape: f32[8,512], index: 0, kind: input, shape index: {}]   ;;  %s1822_s1 = inlined_call_operand.hbm [shape: f32[8,512], index: 1, kind: output, shape index: {}]  }
   0x1   :  { %7 = vsyncpa [#allocation4], 0  ;;  %s1096_s6 = smov [#allocation2]   ;;  %s1048_s10 = scalar_lea.hbm %s1821_s0, 512 }
   0x2   :  { %s14_s7 = sshll.u32 %s1096_s6, 4  ;;  %p1049_p0 = scmp.ne.s32.totalorder %s1821_s0, %s1048_s10  ;;  %s15_s7 = int_to_ptr.vmem [resolvable:$true] %s14_s7 }
   0x3   :  { %p1052_p1 = scmp.lt.u32.totalorder %s1048_s10, %s1821_s0 }
   0x5   :  { %p1054_p2 = pnand %p1052_p1, %p1049_p0 }
   0x7   :  { %1057 = shalt.err (!%p1054_p2)
}
   0x8   :  { %s1058_s15 = scalar_lea.vmem %s15_s7, 512  ;;  %p1063_p4 = scmp.lt.s32.totalorder %s15_s7, %s15_s7 }
   0x9   :  { %p1059_p3 = scmp.ne.s32.totalorder %s15_s7, %s1058_s15  ;;  %p1064_p5 = scmp.lt.s32.totalorder %s1058_s15, %s1058_s15 }
   0xb   :  { %p1065_p6 = por %p1064_p5, %p1063_p4 }
   0xd   :  { %p1066_p7 = pnand %p1065_p6, %p1059_p3 }
   0xf   :  { %1069 = shalt.err (!%p1066_p7)
}
  0x10   :  { %17 = dma.hbm_to_vmem [thread:$0]  %s1821_s0, 512, %s15_s7, [#allocation3]  }
  0x11   :  { %1092 = dma.done.wait [#allocation3], 512  }
  0x12   :  { %1093 = vsyncadd [#allocation3], 4294966784  ;;  %v21_v0 = vld [vmem:[#allocation2] sm:$0xff]  ;;  %v22_v1 = vld [vmem:[#allocation2 + $0x8] sm:$0xff]  ;;  %v1097_v53 = vmov 683565275  }
  0x13   :  { %v23_v2 = vld [vmem:[#allocation2 + $0x10] sm:$0xff]  ;;  %v25_v3 = vmul.f32 500.0, %v21_v0  ;;  %v26_v4 = vmul.f32 500.0, %v22_v1  ;;  %v24_v9 = vld [vmem:[#allocation2 + $0x18] sm:$0xff]  ;;  %v1098_v55 = vmov 2475754826  }
  0x14   :  { %v27_v5 = vmul.f32 500.0, %v23_v2  ;;  %v28_v13 = vmul.f32 500.0, %v24_v9  ;;  %v1099_v57 = vmov 2131351028   ;;  %v1100_v59 = vmov 2102212464  }
  0x15   :  { %v964_v6 = vround.rtne.f32 %v25_v3  ;;  %v965_v7 = vround.rtne.f32 %v26_v4  ;;  %v1101_v61 = vmov 920167782   ;;  %s1103_s0 = smov [#allocation5]  }
  0x16   :  { %v966_v8 = vround.rtne.f32 %v27_v5  ;;  %v967_v20 = vround.rtne.f32 %v28_v13  ;;  %v1102_v5 = vmov 1326507024   ;;  %s919_s18 = sshll.u32 %s1103_s0, 4  ;;  %s920_s18 = int_to_ptr.vmem [resolvable:$true] %s919_s18 }
  0x17   :  { %v33_v10 = vmax.f32 %v964_v6, 0.0  ;;  %v34_v11 = vmax.f32 %v965_v7, 0.0  ;;  %s1070_s19 = scalar_lea.vmem %s920_s18, 512  ;;  %p1075_p9 = scmp.lt.s32.totalorder %s920_s18, %s920_s18 }
  0x18   :  { %v35_v12 = vmax.f32 %v966_v8, 0.0  ;;  %v36_v28 = vmax.f32 %v967_v20, 0.0  ;;  %p1071_p8 = scmp.ne.s32.totalorder %s920_s18, %s1070_s19  ;;  %p1076_p10 = scmp.lt.s32.totalorder %s1070_s19, %s1070_s19 }
  0x19   :  { %v37_v14 = vmin.f32 %v33_v10, 500.0  ;;  %v38_v15 = vmin.f32 %v34_v11, 500.0 }
  0x1a   :  { %v39_v16 = vmin.f32 %v35_v12, 500.0  ;;  %v40_v37 = vmin.f32 %v36_v28, 500.0  ;;  %p1077_p11 = por %p1076_p10, %p1075_p9 }
  0x1b   :  { %v1126_v17 = vsub.f32 501.0, %v37_v14  ;;  %v1128_v18 = vsub.f32 501.0, %v38_v15 }
  0x1c   :  { %v1130_v19 = vsub.f32 501.0, %v39_v16  ;;  %v1150_v44 = vsub.f32 501.0, %v40_v37  ;;  %p1078_p12 = pnand %p1077_p11, %p1071_p8 }
  0x1d   :  { %v1133_v21 = vmul.f32 0.0031104386, %v1126_v17  ;;  %v1136_v22 = vmul.f32 0.0031104386, %v1128_v18 }
  0x1e   :  { %v1139_v23 = vmul.f32 0.0031104386, %v1130_v19 }
  0x1f   :  { %v49_v24 = vand.u32 2147483647, %v1133_v21  ;;  %v52_v25 = vand.u32 2139095040, %v1133_v21  ;;  %v153_v26 = vand.u32 2147483647, %v1136_v22  ;;  %v156_v27 = vand.u32 2139095040, %v1136_v22 }
  0x20   :  { %v260_v33 = vand.u32 2139095040, %v1139_v23 }
  0x21   :  { %v53_v29 = vshrl.u32 %v52_v25, 23  ;;  %v56_v30 = vand.u32 8388607, %v49_v24  ;;  %v157_v31 = vshrl.u32 %v156_v27, 23  ;;  %v160_v32 = vand.u32 8388607, %v153_v26 }
  0x22   :  { %v261_v36 = vshrl.u32 %v260_v33, 23 }
  0x23   :  { %v928_v34 = vadd.s32 4294967169, %v53_v29  ;;  %v932_v35 = vadd.s32 4294967169, %v157_v31  ;;  %v57_v39 = vor.u32 8388608, %v56_v30  ;;  %v161_v40 = vor.u32 8388608, %v160_v32 }
  0x24   :  { %v936_v42 = vadd.s32 4294967169, %v261_v36 }
  0x25   :  { %v59_v38 = vadd.s32 1, %v928_v34  ;;  %v163_v41 = vadd.s32 1, %v932_v35  ;;  %v1152_v48 = vshll.u32 %v57_v39, 8  ;;  %v1154_v50 = vshll.u32 %v161_v40, 8 }
  0x26   :  { %v1156_v51 = vadd.s32 1, %v936_v42 }
  0x27   :  { %vm60_vm0 = vcmp.gt.s32.totalorder %v59_v38, 0  ;;  %vm164_vm1 = vcmp.gt.s32.totalorder %v163_v41, 0 }
  0x28   :  { %v61_v43 = vsel %vm60_vm0, %v59_v38, 0  ;;  %v165_v47 = vsel %vm164_vm1, %v163_v41, 0  ;;  %vm268_vm6 = vcmp.gt.s32.totalorder %v1156_v51, 0 }
  0x29   :  { %v62_v45 = vshrl.u32 %v61_v43, 5  ;;  %v63_v46 = vand.u32 31, %v61_v43  ;;  %v167_v49 = vand.u32 31, %v165_v47  ;;  %v1163_v63 = vshrl.u32 %v165_v47, 5 }
  0x2b   :  { %v64_v52 = vsub.s32 32, %v63_v46  ;;  %v66_v54 = vshll.u32 %v1097_v53, %v63_v46  ;;  %v69_v56 = vshll.u32 %v1098_v55, %v63_v46  ;;  %v72_v58 = vshll.u32 %v1099_v57, %v63_v46 }
  0x2c   :  { %v75_v60 = vshll.u32 %v1100_v59, %v63_v46  ;;  %v78_v62 = vshll.u32 %v1101_v61, %v63_v46  ;;  %vm81_vm2 = vcmp.lt.s32.totalorder %v62_v45, 1  ;;  %vm82_vm3 = vcmp.lt.s32.totalorder %v62_v45, 2 }
  0x2d   :  { %v65_v0 = vshrl.u32 %v1097_v53, %v64_v52  ;;  %v67_v1 = vshrl.u32 %v1098_v55, %v64_v52  ;;  %v70_v2 = vshrl.u32 %v1099_v57, %v64_v52  ;;  %v73_v3 = vshrl.u32 %v1100_v59, %v64_v52 }
  0x2e   :  { %v76_v4 = vshrl.u32 %v1101_v61, %v64_v52  ;;  %v79_v6 = vshrl.u32 %v1102_v5, %v64_v52  ;;  %vm84_vm4 = vcmp.lt.s32.totalorder %v62_v45, 4  ;;  %v168_v10 = vsub.s32 32, %v167_v49 }
  0x2f   :  { %v68_v7 = vor.u32 %v67_v1, %v66_v54  ;;  %v71_v8 = vor.u32 %v70_v2, %v69_v56  ;;  %v74_v9 = vor.u32 %v73_v3, %v72_v58  ;;  %vm83_vm5 = vcmp.lt.s32.totalorder %v62_v45, 3 }
  0x30   :  { %v77_v11 = vor.u32 %v76_v4, %v75_v60  ;;  %v80_v12 = vor.u32 %v79_v6, %v78_v62  ;;  %v170_v13 = vshll.u32 %v1097_v53, %v167_v49  ;;  %v173_v29 = vshll.u32 %v1098_v55, %v167_v49 }
  0x31   :  { %v85_v14 = vsel %vm81_vm2, %v65_v0, %v68_v7  ;;  %v86_v15 = vsel %vm84_vm4, %v74_v9, 2102212464  ;;  %v89_v16 = vsel %vm81_vm2, %v68_v7, %v71_v8  ;;  %v93_v20 = vsel %vm81_vm2, %v71_v8, %v74_v9 }
  0x32   :  { %v87_v25 = vsel %vm83_vm5, %v71_v8, %v86_v15  ;;  %v90_v27 = vsel %vm84_vm4, %v77_v11, 920167782  ;;  %v94_v28 = vsel %vm84_vm4, %v80_v12, 1326507024  ;;  %v169_v32 = vshrl.u32 %v1097_v53, %v168_v10 }
  0x33   :  { %v91_v30 = vsel %vm83_vm5, %v74_v9, %v90_v27  ;;  %v95_v31 = vsel %vm83_vm5, %v77_v11, %v94_v28  ;;  %v171_v33 = vshrl.u32 %v1098_v55, %v168_v10  ;;  %v88_v34 = vsel %vm82_vm3, %v85_v14, %v87_v25 }
  0x34   :  { %v92_v35 = vsel %vm82_vm3, %v89_v16, %v91_v30  ;;  %v96_v36 = vsel %vm82_vm3, %v93_v20, %v95_v31  ;;  %v174_v37 = vshrl.u32 %v1099_v57, %v168_v10  ;;  %v176_v46 = vshll.u32 %v1099_v57, %v167_v49 }
  0x35   :  { %v1184_v38 = vmul.u32.u64.low %v1152_v48, %v96_v36  ;;  %v1185_v39 = vmul.u32.u64.high %v1152_v48, %v96_v36, %v1184_v38  ;;  %v1188_v40 = vmul.u32.u64.low %v1152_v48, %v92_v35  ;;  %v1189_v41 = vmul.u32.u64.high %v1152_v48, %v92_v35, %v1188_v40 }
  0x36   :  { %v172_v42 = vor.u32 %v171_v33, %v170_v13  ;;  %v175_v43 = vor.u32 %v174_v37, %v173_v29  ;;  %v177_v47 = vshrl.u32 %v1100_v59, %v168_v10  ;;  %v179_v45 = vshll.u32 %v1100_v59, %v167_v49 }
  0x37   :  { %v180_v52 = vshrl.u32 %v1101_v61, %v168_v10  ;;  %v182_v54 = vshll.u32 %v1101_v61, %v167_v49  ;;  %v183_v56 = vshrl.u32 %v1102_v5, %v168_v10  ;;  %v104_v58 = vmul.u32 %v1152_v48, %v88_v34 }
  0x38   :  { %v178_v60 = vor.u32 %v177_v47, %v176_v46  ;;  %vm185_vm7 = vcmp.lt.s32.totalorder %v1163_v63, 1  ;;  %vm186_vm8 = vcmp.lt.s32.totalorder %v1163_v63, 2  ;;  %vm106_vm9 = vc.u32 %v1185_v39, %v1188_v40 }
  0x39   :  { %v107_v62 = vadd.s32 1, %v1189_v41  ;;  %v181_v0 = vor.u32 %v180_v52, %v179_v45  ;;  %vm187_vm10 = vcmp.lt.s32.totalorder %v1163_v63, 3  ;;  %v184_v1 = vor.u32 %v183_v56, %v182_v54 }
  0x3a   :  { %vm188_vm11 = vcmp.lt.s32.totalorder %v1163_v63, 4  ;;  %v189_v49 = vsel %vm185_vm7, %v169_v32, %v172_v42  ;;  %v193_v2 = vsel %vm185_vm7, %v172_v42, %v175_v43  ;;  %v197_v6 = vsel %vm185_vm7, %v175_v43, %v178_v60 }
  0x3b   :  { %v108_v48 = vsel %vm106_vm9, %v107_v62, %v1189_v41  ;;  %v190_v3 = vsel %vm188_vm11, %v178_v60, 2102212464  ;;  %v194_v4 = vsel %vm188_vm11, %v181_v0, 920167782  ;;  %v198_v10 = vsel %vm188_vm11, %v184_v1, 1326507024 }
  0x3c   :  { %v109_v7 = vadd.s32 %v108_v48, %v104_v58  ;;  %v191_v8 = vsel %vm187_vm10, %v175_v43, %v190_v3  ;;  %v195_v9 = vsel %vm187_vm10, %v178_v60, %v194_v4  ;;  %v199_v13 = vsel %vm187_vm10, %v181_v0, %v198_v10 }
  0x3d   :  { %v192_v11 = vsel %vm186_vm8, %v189_v49, %v191_v8  ;;  %v196_v12 = vsel %vm186_vm8, %v193_v2, %v195_v9  ;;  %v269_v14 = vsel %vm268_vm6, %v1156_v51, 0  ;;  %v200_v16 = vsel %vm186_vm8, %v197_v6, %v199_v13 }
  0x3e   :  { %v110_v15 = vadd.s32 536870912, %v109_v7  ;;  %v1217_v20 = vmul.u32.u64.low %v1154_v50, %v196_v12  ;;  %v1218_v25 = vmul.u32.u64.high %v1154_v50, %v196_v12, %v1217_v20  ;;  %v271_v30 = vand.u32 31, %v269_v14 }
  0x3f   :  { %v1222_v27 = vmul.u32.u64.low %v1154_v50, %v200_v16  ;;  %v1223_v28 = vmul.u32.u64.high %v1154_v50, %v200_v16, %v1222_v27  ;;  %v1228_v31 = vmul.f32 0.0031104386, %v1150_v44  ;;  %v208_v51 = vmul.u32 %v1154_v50, %v192_v11 }
  0x40   :  { %v1225_v29 = vshrl.u32 %v110_v15, 30  ;;  %v211_v32 = vadd.s32 1, %v1218_v25  ;;  %v272_v33 = vsub.s32 32, %v271_v30  ;;  %v257_v36 = vand.u32 2147483647, %v1139_v23 }
  0x41   :  { %vm210_vm12 = vc.u32 %v1223_v28, %v1217_v20  ;;  %v270_v38 = vshrl.u32 %v269_v14, 5  ;;  %v274_v41 = vshll.u32 %v1097_v53, %v271_v30  ;;  %v364_v50 = vand.u32 2139095040, %v1228_v31 }
  0x42   :  { %v112_v63 = vshll.u32 %v1225_v29, 30  ;;  %v212_v35 = vsel %vm210_vm12, %v211_v32, %v1218_v25  ;;  %v275_v43 = vshrl.u32 %v1098_v55, %v272_v33  ;;  %v277_v46 = vshll.u32 %v1098_v55, %v271_v30 }
  0x43   :  { %v213_v37 = vadd.s32 %v212_v35, %v208_v51  ;;  %v278_v47 = vshrl.u32 %v1099_v57, %v272_v33  ;;  %v280_v52 = vshll.u32 %v1099_v57, %v271_v30  ;;  %v281_v54 = vshrl.u32 %v1100_v59, %v272_v33 }
  0x44   :  { %v1235_v34 = vsub.s32 %v109_v7, %v112_v63  ;;  %v283_v56 = vshll.u32 %v1100_v59, %v271_v30  ;;  %v264_v60 = vand.u32 8388607, %v257_v36  ;;  %v284_v62 = vshrl.u32 %v1101_v61, %v272_v33 }
  0x45   :  { %v214_v45 = vadd.s32 536870912, %v213_v37  ;;  %v286_v1 = vshll.u32 %v1101_v61, %v271_v30  ;;  %v287_v49 = vshrl.u32 %v1102_v5, %v272_v33  ;;  %v365_v2 = vshrl.u32 %v364_v50, 23 }
  0x46   :  { %v115_v42 = vsub.s32 0, %v1235_v34  ;;  %v276_v3 = vor.u32 %v275_v43, %v274_v41  ;;  %v279_v4 = vor.u32 %v278_v47, %v277_v46  ;;  %vm292_vm13 = vcmp.lt.s32.totalorder %v270_v38, 4 }
  0x47   :  { %v1252_v0 = vshrl.u32 %v214_v45, 30  ;;  %v282_v7 = vor.u32 %v281_v54, %v280_v52  ;;  %v285_v8 = vor.u32 %v284_v62, %v283_v56  ;;  %vm289_vm14 = vcmp.lt.s32.totalorder %v270_v38, 1 }
  0x48   :  { %v929_v58 = vmin.u32 %v115_v42, %v1235_v34  ;;  %v265_v10 = vor.u32 8388608, %v264_v60  ;;  %v288_v11 = vor.u32 %v287_v49, %v286_v1  ;;  %vm291_vm15 = vcmp.lt.s32.totalorder %v270_v38, 3 }
  0x49   :  { %v216_v6 = vshll.u32 %v1252_v0, 30  ;;  %v273_v13 = vshrl.u32 %v1097_v53, %v272_v33  ;;  %v298_v14 = vsel %vm292_vm13, %v285_v8, 920167782  ;;  %v940_v15 = vadd.s32 4294967169, %v365_v2 }
  0x4a   :  { %v117_v48 = vclz %v929_v58  ;;  %vm290_vm1 = vcmp.lt.s32.totalorder %v270_v38, 2  ;;  %v294_v16 = vsel %vm292_vm13, %v282_v7, 2102212464  ;;  %v297_v25 = vsel %vm289_vm14, %v276_v3, %v279_v4 }
  0x4b   :  { %v1257_v12 = vsub.s32 %v213_v37, %v216_v6  ;;  %v299_v51 = vsel %vm291_vm15, %v282_v7, %v298_v14  ;;  %v301_v63 = vsel %vm289_vm14, %v279_v4, %v282_v7  ;;  %v302_v35 = vsel %vm292_vm13, %v288_v11, 1326507024 }
  0x4c   :  { %v930_v9 = vadd.s32 4294967294, %v117_v48  ;;  %v305_v33 = vshll.u32 %v265_v10, 8  ;;  %v293_v41 = vsel %vm289_vm14, %v273_v13, %v276_v3  ;;  %v295_v50 = vsel %vm291_vm15, %v279_v4, %v294_v16 }
  0x4d   :  { %v219_v30 = vsub.s32 0, %v1257_v12  ;;  %v303_v42 = vsel %vm291_vm15, %v285_v8, %v302_v35  ;;  %v300_v43 = vsel %vm290_vm1, %v297_v25, %v299_v51  ;;  %v371_v47 = vadd.s32 1, %v940_v15 }
  0x4e   :  { %vm931_vm0 = vcmp.lt.s32.totalorder %v930_v9, 0  ;;  %v304_v46 = vsel %vm290_vm1, %v301_v63, %v303_v42  ;;  %v105_v45 = vadd.s32 %v1188_v40, %v1185_v39  ;;  %v296_v58 = vsel %vm290_vm1, %v293_v41, %v295_v50 }
  0x4f   :  { %v120_v27 = vsel %vm931_vm0, 0, %v930_v9  ;;  %v933_v37 = vmin.u32 %v219_v30, %v1257_v12  ;;  %v1276_v60 = vmul.u32.u64.low %v305_v33, %v304_v46  ;;  %v1277_v62 = vmul.u32.u64.high %v305_v33, %v304_v46, %v1276_v60 }
  0x50   :  { %v125_v32 = vsub.s32 4294967266, %v120_v27  ;;  %v121_v52 = vsub.s32 32, %v120_v27  ;;  %v361_v1 = vand.u32 2147483647, %v1228_v31  ;;  %vm372_vm2 = vcmp.gt.s32.totalorder %v371_v47, 0 }
  0x51   :  { %v221_v56 = vclz %v933_v37  ;;  %v1280_v2 = vmul.u32.u64.low %v305_v33, %v300_v43  ;;  %v1281_v48 = vmul.u32.u64.high %v305_v33, %v300_v43, %v1280_v2  ;;  %v373_v3 = vsel %vm372_vm2, %v371_v47, 0 }
  0x52   :  { %v126_v54 = vadd.s32 127, %v125_v32  ;;  %v122_v4 = vshll.u32 %v1235_v34, %v120_v27  ;;  %v123_v39 = vshrl.u32 %v105_v45, %v121_v52  ;;  %v375_v6 = vand.u32 31, %v373_v3 }
  0x53   :  { %v934_v49 = vadd.s32 4294967294, %v221_v56  ;;  %v312_v38 = vmul.u32 %v305_v33, %v296_v58  ;;  %vm314_vm4 = vc.u32 %v1277_v62, %v1280_v2  ;;  %v368_v7 = vand.u32 8388607, %v361_v1 }
  0x54   :  { %v127_v40 = vshll.u32 %v126_v54, 23  ;;  %v315_v8 = vadd.s32 1, %v1281_v48  ;;  %v376_v9 = vsub.s32 32, %v375_v6  ;;  %v124_v10 = vor.u32 %v123_v39, %v122_v4 }
  0x55   :  { %vm935_vm3 = vcmp.lt.s32.totalorder %v934_v49, 0  ;;  %v369_v15 = vor.u32 8388608, %v368_v7  ;;  %v378_v16 = vshll.u32 %v1097_v53, %v375_v6  ;;  %v381_v27 = vshll.u32 %v1098_v55, %v375_v6 }
  0x56   :  { %v128_v11 = vor.u32 4788187, %v127_v40  ;;  %v224_v13 = vsel %vm935_vm3, 0, %v934_v49  ;;  %v316_v14 = vsel %vm314_vm4, %v315_v8, %v1281_v48  ;;  %v379_v25 = vshrl.u32 %v1098_v55, %v376_v9 }
  0x57   :  { %v317_v34 = vadd.s32 %v316_v14, %v312_v38  ;;  %v382_v30 = vshrl.u32 %v1099_v57, %v376_v9  ;;  %v229_v51 = vsub.s32 4294967266, %v224_v13  ;;  %v374_v32 = vshrl.u32 %v373_v3, 5 }
  0x58   :  { %v387_v35 = vshll.u32 %v1100_v59, %v375_v6  ;;  %v129_v33 = vand.u32 2147483647, %v128_v11  ;;  %v131_v37 = vcvt.s32.f32 %v124_v10  ;;  %v384_v41 = vshll.u32 %v1099_v57, %v375_v6 }
  0x59   :  { %v318_v63 = vadd.s32 536870912, %v317_v34  ;;  %v385_v50 = vshrl.u32 %v1100_v59, %v376_v9  ;;  %v209_v42 = vadd.s32 %v1217_v20, %v1223_v28  ;;  %v225_v43 = vsub.s32 32, %v224_v13 }
  0x5a   :  { %v388_v47 = vshrl.u32 %v1101_v61, %v376_v9  ;;  %v380_v45 = vor.u32 %v379_v25, %v378_v16  ;;  %v383_v52 = vor.u32 %v382_v30, %v381_v27  ;;  %v390_v54 = vshll.u32 %v1101_v61, %v375_v6 }
  0x5b   :  { %v1300_v46 = vshrl.u32 %v318_v63, 30  ;;  %v391_v56 = vshrl.u32 %v1102_v5, %v376_v9  ;;  %v230_v58 = vadd.s32 127, %v229_v51  ;;  %vm393_vm5 = vcmp.lt.s32.totalorder %v374_v32, 1 }
  0x5c   :  { %v389_v49 = vor.u32 %v388_v47, %v387_v35  ;;  %v132_v48 = vmul.f32 %v131_v37, %v129_v33  ;;  %v386_v3 = vor.u32 %v385_v50, %v384_v41  ;;  %v409_v4 = vshll.u32 %v369_v15, 8 }
  0x5d   :  { %v320_v60 = vshll.u32 %v1300_v46, 30  ;;  %v377_v28 = vshrl.u32 %v1097_v53, %v376_v9  ;;  %vm395_vm6 = vcmp.lt.s32.totalorder %v374_v32, 3  ;;  %vm396_vm7 = vcmp.lt.s32.totalorder %v374_v32, 4 }
  0x5e   :  { %v392_v39 = vor.u32 %v391_v56, %v390_v54  ;;  %vm394_vm8 = vcmp.lt.s32.totalorder %v374_v32, 2  ;;  %v398_v40 = vsel %vm396_vm7, %v386_v3, 2102212464  ;;  %v401_v6 = vsel %vm393_vm5, %v380_v45, %v383_v52 }
  0x5f   :  { %v1306_v20 = vsub.s32 %v317_v34, %v320_v60  ;;  %v226_v38 = vshll.u32 %v1257_v12, %v224_v13  ;;  %v227_v7 = vshrl.u32 %v209_v42, %v225_v43  ;;  %v231_v8 = vshll.u32 %v230_v58, 23 }
  0x60   :  { %v402_v10 = vsel %vm396_vm7, %v389_v49, 920167782  ;;  %v133_v34 = vxor.u32 2147483648, %v132_v48  ;;  %v397_v9 = vsel %vm393_vm5, %v377_v28, %v380_v45  ;;  %v399_v15 = vsel %vm395_vm6, %v383_v52, %v398_v40 }
  0x61   :  { %v323_v11 = vsub.s32 0, %v1306_v20  ;;  %v403_v14 = vsel %vm395_vm6, %v386_v3, %v402_v10  ;;  %v405_v25 = vsel %vm393_vm5, %v383_v52, %v386_v3  ;;  %v406_v27 = vsel %vm396_vm7, %v392_v39, 1326507024 }
  0x62   :  { %v404_v16 = vsel %vm394_vm8, %v401_v6, %v403_v14  ;;  %vm51_vm9 = vcmp.lt.s32.totalorder %v1133_v21, 0  ;;  %v228_v30 = vor.u32 %v227_v7, %v226_v38  ;;  %v232_v51 = vor.u32 4788187, %v231_v8 }
  0x63   :  { %v1320_v12 = vmul.u32.u64.low %v409_v4, %v404_v16  ;;  %v1321_v13 = vmul.u32.u64.high %v409_v4, %v404_v16, %v1320_v12  ;;  %v465_v63 = vmul.f32 2.0, %v1126_v17  ;;  %v937_v35 = vmin.u32 %v323_v11, %v1306_v20 }
  0x64   :  { %v407_v33 = vsel %vm395_vm6, %v389_v49, %v406_v27  ;;  %v400_v37 = vsel %vm394_vm8, %v397_v9, %v399_v15  ;;  %vm1332_vm10 = vcmp.le.f32.partialorder %v49_v24, 0.7853982  ;;  %v134_v42 = vsel %vm51_vm9, %v133_v34, %v132_v48 }
  0x65   :  { %v408_v41 = vsel %vm394_vm8, %v405_v25, %v407_v33  ;;  %v233_v17 = vand.u32 2147483647, %v232_v51  ;;  %v235_v45 = vcvt.s32.f32 %v228_v30  ;;  %v419_v52 = vadd.s32 1, %v1321_v13 }
  0x66   :  { %v1338_v43 = vmul.u32.u64.low %v409_v4, %v408_v41  ;;  %v1339_v47 = vmul.u32.u64.high %v409_v4, %v408_v41, %v1338_v43  ;;  %v944_v54 = vadd.f32 -1.0, %v465_v63  ;;  %v135_v32 = vsub.s32 4, %v1225_v29 }
  0x67   :  { %v325_v56 = vclz %v937_v35  ;;  %v416_v58 = vmul.u32 %v409_v4, %v400_v37  ;;  %v137_v24 = vsel %vm1332_vm10, %v1133_v21, %v134_v42  ;;  %v239_v60 = vsub.s32 4, %v1252_v0 }
  0x68   :  { %v343_v49 = vsub.s32 4, %v1300_v46  ;;  %vm418_vm11 = vc.u32 %v1339_v47, %v1320_v12  ;;  %v1350_v48 = vmul.f32 0.0031104386, %v944_v54  ;;  %v236_v3 = vmul.f32 %v235_v45, %v233_v17 }
  0x69   :  { %v420_v28 = vsel %vm418_vm11, %v419_v52, %v1321_v13  ;;  %v466_v39 = vmul.f32 2.0, %v1128_v18  ;;  %v136_v4 = vsel %vm51_vm9, %v135_v32, %v1225_v29  ;;  %1008 = vcosq.f32 %v137_v24 }
  0x6a   :  { %v938_v40 = vadd.s32 4294967294, %v325_v56  ;;  %v421_v6 = vadd.s32 %v420_v28, %v416_v58  ;;  %vm155_vm12 = vcmp.lt.s32.totalorder %v1136_v22, 0  ;;  %vm259_vm13 = vcmp.lt.s32.totalorder %v1139_v23, 0 }
  0x6b   :  { %v480_v38 = vand.u32 2139095040, %v1350_v48  ;;  %v240_v7 = vsel %vm155_vm12, %v239_v60, %v1252_v0  ;;  %v344_v18 = vsel %vm259_vm13, %v343_v49, %v1300_v46  ;;  %v138_v29 = vsel %vm1332_vm10, 0, %v136_v4 }
  0x6c   :  { %v237_v8 = vxor.u32 2147483648, %v236_v3  ;;  %v945_v10 = vadd.f32 -1.0, %v466_v39  ;;  %vm1370_vm14 = vcmp.le.f32.partialorder %v153_v26, 0.7853982  ;;  %vm1376_vm15 = vcmp.le.f32.partialorder %v257_v36, 0.7853982 }
  0x6d   :  { %v481_v11 = vshrl.u32 %v480_v38, 23  ;;  %vm939_vm0 = vcmp.lt.s32.totalorder %v938_v40, 0  ;;  %v422_v46 = vadd.s32 536870912, %v421_v6  ;;  %v242_v34 = vsel %vm1370_vm14, 0, %v240_v7 }
  0x6e   :  { %v346_v9 = vsel %vm1376_vm15, 0, %v344_v18  ;;  %v142_v16 = vadd.s32 3, %v138_v29  ;;  %v238_v26 = vsel %vm155_vm12, %v237_v8, %v236_v3  ;;  %v1386_v25 = vsel %vm939_vm0, 0, %v938_v40 }
  0x6f   :  { %v948_v15 = vadd.s32 4294967169, %v481_v11  ;;  %v1388_v27 = vmul.f32 0.0031104386, %v945_v10  ;;  %1010 = vsinq.f32 %v137_v24  ;;  %v246_v13 = vadd.s32 3, %v242_v34 }
  0x70   :  { %v350_v30 = vadd.s32 3, %v346_v9  ;;  %v1390_v51 = vshrl.u32 %v422_v46, 30  ;;  %v477_v63 = vand.u32 2147483647, %v1350_v48  ;;  %v1398_v33 = vsel %vm1370_vm14, %v1136_v22, %v238_v26 }
  0x71   :  { %v487_v36 = vadd.s32 1, %v948_v15  ;;  %v333_v37 = vsub.s32 4294967266, %v1386_v25  ;;  %v1401_v50 = vand.u32 3, %v142_v16  ;;  %v1404_v42 = vmul.f32 2.0, %v1130_v19 }
  0x72   :  { %v584_v17 = vand.u32 2139095040, %v1388_v27  ;;  %v1407_v45 = vand.u32 3, %v246_v13  ;;  %v313_v52 = vadd.s32 %v1280_v2, %v1277_v62  ;;  %v1411_v54 = vand.u32 3, %v350_v30 }
  0x73   :  { %vm488_vm1 = vcmp.gt.s32.totalorder %v487_v36, 0  ;;  %v1393_v35 = vpop.eup %1008  ;;  %v424_v32 = vshll.u32 %v1390_v51, 30  ;;  %1012 = vcosq.f32 %v1398_v33  ;;  %v484_v19 = vand.u32 8388607, %v477_v63 }
  0x74   :  { %v489_v41 = vsel %vm488_vm1, %v487_v36, 0  ;;  %v149_v56 = vxor.u32 2147483648, %v1393_v35  ;;  %v329_v24 = vsub.s32 32, %v1386_v25  ;;  %v334_v60 = vadd.s32 127, %v333_v37 }
  0x75   :  { %v491_v43 = vand.u32 31, %v489_v41  ;;  %vm145_vm2 = vcmp.eq.s32.totalorder %v1401_v50, 0  ;;  %vm148_vm3 = vcmp.eq.s32.totalorder %v1401_v50, 2  ;;  %v490_v62 = vshrl.u32 %v489_v41, 5 }
  0x76   :  { %v585_v39 = vshrl.u32 %v584_v17, 23  ;;  %v1425_v4 = vsub.s32 %v421_v6, %v424_v32  ;;  %v330_v18 = vshll.u32 %v1306_v20, %v1386_v25  ;;  %v485_v29 = vor.u32 8388608, %v484_v19 }
  0x77   :  { %v492_v58 = vsub.s32 32, %v491_v43  ;;  %v494_v49 = vshll.u32 %v1097_v53, %v491_v43  ;;  %v497_v3 = vshll.u32 %v1098_v55, %v491_v43  ;;  %v500_v40 = vshll.u32 %v1099_v57, %v491_v43 }
  0x78   :  { %v503_v7 = vshll.u32 %v1100_v59, %v491_v43  ;;  %v506_v10 = vshll.u32 %v1101_v61, %v491_v43  ;;  %v331_v14 = vshrl.u32 %v313_v52, %v329_v24  ;;  %vm144_vm4 = vcmp.lt.s32.totalorder %v1401_v50, 2 }
  0x79   :  { %v495_v2 = vshrl.u32 %v1098_v55, %v492_v58  ;;  %v498_v28 = vshrl.u32 %v1099_v57, %v492_v58  ;;  %v501_v38 = vshrl.u32 %v1100_v59, %v492_v58  ;;  %v504_v8 = vshrl.u32 %v1101_v61, %v492_v58  ;;  %v1011_v11 = vpop.eup %1010 }
  0x7a   :  { %v507_v6 = vshrl.u32 %v1102_v5, %v492_v58  ;;  %vm509_vm5 = vcmp.lt.s32.totalorder %v490_v62, 1  ;;  %v952_v16 = vadd.s32 4294967169, %v585_v39  ;;  %v335_v26 = vshll.u32 %v334_v60, 23 }
  0x7b   :  { %v496_v46 = vor.u32 %v495_v2, %v494_v49  ;;  %v499_v34 = vor.u32 %v498_v28, %v497_v3  ;;  %v502_v9 = vor.u32 %v501_v38, %v500_v40  ;;  %v505_v15 = vor.u32 %v504_v8, %v503_v7 }
  0x7c   :  { %v427_v20 = vsub.s32 0, %v1425_v4  ;;  %v508_v25 = vor.u32 %v507_v6, %v506_v10  ;;  %vm511_vm6 = vcmp.lt.s32.totalorder %v490_v62, 3  ;;  %v146_v36 = vxor.u32 2147483648, %v1011_v11 }
  0x7d   :  { %v493_v13 = vshrl.u32 %v1097_v53, %v492_v58  ;;  %vm512_vm7 = vcmp.lt.s32.totalorder %v490_v62, 4  ;;  %v525_v30 = vshll.u32 %v485_v29, 8  ;;  %vm510_vm8 = vcmp.lt.s32.totalorder %v490_v62, 2  ;;  %v1439_v17 = vpop.eup %1012 }
  0x7e   :  { %v514_v37 = vsel %vm512_vm7, %v502_v9, 2102212464  ;;  %v517_v41 = vsel %vm509_vm5, %v496_v46, %v499_v34  ;;  %v518_v43 = vsel %vm512_vm7, %v505_v15, 920167782  ;;  %v521_v32 = vsel %vm509_vm5, %v499_v34, %v502_v9 }
  0x7f   :  { %v519_v52 = vsel %vm511_vm6, %v502_v9, %v518_v43  ;;  %v522_v19 = vsel %vm512_vm7, %v508_v25, 1326507024  ;;  %v591_v24 = vadd.s32 1, %v952_v16  ;;  %v332_v60 = vor.u32 %v331_v14, %v330_v18 }
  0x80   :  { %v336_v49 = vor.u32 4788187, %v335_v26  ;;  %v941_v3 = vmin.u32 %v427_v20, %v1425_v4  ;;  %v468_v58 = vmul.f32 2.0, %v1150_v44  ;;  %v513_v2 = vsel %vm509_vm5, %v493_v13, %v496_v46 }
  0x81   :  { %v515_v28 = vsel %vm511_vm6, %v499_v34, %v514_v37  ;;  %v520_v39 = vsel %vm510_vm8, %v517_v41, %v519_v52  ;;  %v523_v40 = vsel %vm511_vm6, %v505_v15, %v522_v19  ;;  %v147_v38 = vsel %vm145_vm2, %v1393_v35, %v146_v36 }
  0x82   :  { %v150_v7 = vsel %vm148_vm3, %v149_v56, %v1011_v11  ;;  %v946_v18 = vadd.f32 -1.0, %v1404_v42  ;;  %v524_v29 = vsel %vm510_vm8, %v521_v32, %v523_v40  ;;  %v581_v10 = vand.u32 2147483647, %v1388_v27 }
  0x83   :  { %v1456_v44 = vmul.u32.u64.low %v525_v30, %v524_v29  ;;  %v1457_v8 = vmul.u32.u64.high %v525_v30, %v524_v29, %v1456_v44  ;;  %vm592_vm9 = vcmp.gt.s32.totalorder %v591_v24, 0  ;;  %v429_v14 = vclz %v941_v3 }
  0x84   :  { %v516_v46 = vsel %vm510_vm8, %v513_v2, %v515_v28  ;;  %v1461_v34 = vmul.u32.u64.low %v525_v30, %v520_v39  ;;  %v1462_v6 = vmul.u32.u64.high %v525_v30, %v520_v39, %v1461_v34  ;;  %1014 = vsinq.f32 %v1398_v33 }
  0x85   :  { %v337_v35 = vand.u32 2147483647, %v336_v49  ;;  %v339_v56 = vcvt.s32.f32 %v332_v60  ;;  %v593_v42 = vsel %vm592_vm9, %v591_v24, 0  ;;  %v1468_v11 = vsel %vm144_vm4, %v147_v38, %v150_v7 }
  0x86   :  { %v1470_v9 = vadd.f32 -1.0, %v468_v58  ;;  %v1472_v15 = vmul.f32 0.0031104386, %v946_v18  ;;  %v595_v16 = vand.u32 31, %v593_v42  ;;  %v253_v62 = vxor.u32 2147483648, %v1439_v17 }
  0x87   :  { %v532_v26 = vmul.u32 %v525_v30, %v516_v46  ;;  %vm534_vm10 = vc.u32 %v1457_v8, %v1461_v34  ;;  %v588_v33 = vand.u32 8388607, %v581_v10  ;;  %v942_v20 = vadd.s32 4294967294, %v429_v14 }
  0x88   :  { %v535_v25 = vadd.s32 1, %v1462_v6  ;;  %v596_v50 = vsub.s32 32, %v595_v16  ;;  %v598_v36 = vshll.u32 %v1097_v53, %v595_v16  ;;  %v1481_v13 = vmul.f32 %v339_v56, %v337_v35 }
  0x89   :  { %v594_v37 = vshrl.u32 %v593_v42, 5  ;;  %v601_v41 = vshll.u32 %v1098_v55, %v595_v16  ;;  %v604_v43 = vshll.u32 %v1099_v57, %v595_v16  ;;  %v607_v32 = vshll.u32 %v1100_v59, %v595_v16 }
  0x8a   :  { %v536_v30 = vsel %vm534_vm10, %v535_v25, %v1462_v6  ;;  %v599_v52 = vshrl.u32 %v1098_v55, %v596_v50  ;;  %v610_v19 = vshll.u32 %v1101_v61, %v595_v16  ;;  %vm141_vm11 = vweird.f32 %v1133_v21 }
  0x8b   :  { %v537_v24 = vadd.s32 %v536_v30, %v532_v26  ;;  %v589_v60 = vor.u32 8388608, %v588_v33  ;;  %v602_v49 = vshrl.u32 %v1099_v57, %v596_v50  ;;  %v605_v3 = vshrl.u32 %v1100_v59, %v596_v50 }
  0x8c   :  { %vm249_vm12 = vcmp.eq.s32.totalorder %v1407_v45, 0  ;;  %vm252_vm14 = vcmp.eq.s32.totalorder %v1407_v45, 2  ;;  %vm943_vm0 = vcmp.lt.s32.totalorder %v942_v20, 0  ;;  %v600_v58 = vor.u32 %v599_v52, %v598_v36 }
  0x8d   :  { %v608_v2 = vshrl.u32 %v1101_v61, %v596_v50  ;;  %v611_v28 = vshrl.u32 %v1102_v5, %v596_v50  ;;  %v538_v39 = vadd.s32 536870912, %v537_v24  ;;  %v597_v40 = vshrl.u32 %v1097_v53, %v596_v50 }
  0x8e   :  { %v603_v38 = vor.u32 %v602_v49, %v601_v41  ;;  %v606_v7 = vor.u32 %v605_v3, %v604_v43  ;;  %vm613_vm1 = vcmp.lt.s32.totalorder %v594_v37, 1  ;;  %v688_v44 = vand.u32 2139095040, %v1472_v15  ;;  %v1015_v14 = vpop.eup %1014 }
  0x8f   :  { %v609_v18 = vor.u32 %v608_v2, %v607_v32  ;;  %v612_v29 = vor.u32 %v611_v28, %v610_v19  ;;  %vm248_vm2 = vcmp.lt.s32.totalorder %v1407_v45, 2  ;;  %v539_v46 = vshrl.u32 %v538_v39, 30 }
  0x90   :  { %vm614_vm3 = vcmp.lt.s32.totalorder %v594_v37, 2  ;;  %vm615_vm4 = vcmp.lt.s32.totalorder %v594_v37, 3  ;;  %vm616_vm5 = vcmp.lt.s32.totalorder %v594_v37, 4  ;;  %v621_v35 = vsel %vm613_vm1, %v600_v58, %v603_v38 }
  0x91   :  { %v618_v6 = vsel %vm616_vm5, %v606_v7, 2102212464  ;;  %v622_v56 = vsel %vm616_vm5, %v609_v18, 920167782  ;;  %v629_v42 = vshll.u32 %v589_v60, 8  ;;  %v540_v16 = vshll.u32 %v539_v46, 30 }
  0x92   :  { %v617_v26 = vsel %vm613_vm1, %v597_v40, %v600_v58  ;;  %v623_v33 = vsel %vm615_vm4, %v606_v7, %v622_v56  ;;  %v625_v25 = vsel %vm613_vm1, %v603_v38, %v606_v7  ;;  %v619_v50 = vsel %vm615_vm4, %v603_v38, %v618_v6 }
  0x93   :  { %v624_v36 = vsel %vm614_vm3, %v621_v35, %v623_v33  ;;  %v626_v41 = vsel %vm616_vm5, %v612_v29, 1326507024  ;;  %v689_v43 = vshrl.u32 %v688_v44, 23  ;;  %v250_v30 = vxor.u32 2147483648, %v1015_v14 }
  0x94   :  { %v1503_v52 = vsel %vm943_vm0, 0, %v942_v20  ;;  %v1505_v32 = vsub.s32 %v537_v24, %v540_v16  ;;  %v627_v19 = vsel %vm615_vm4, %v609_v18, %v626_v41  ;;  %v341_v60 = vxor.u32 2147483648, %v1481_v13 }
  0x95   :  { %v628_v49 = vsel %vm614_vm3, %v625_v25, %v627_v19  ;;  %v1510_v3 = vmul.u32.u64.low %v629_v42, %v624_v36  ;;  %v1511_v58 = vmul.u32.u64.high %v629_v42, %v624_v36, %v1510_v3  ;;  %v620_v28 = vsel %vm614_vm3, %v617_v26, %v619_v50 }
  0x96   :  { %v543_v2 = vsub.s32 0, %v1505_v32  ;;  %v1516_v39 = vmul.u32.u64.low %v629_v42, %v628_v49  ;;  %v1517_v40 = vmul.u32.u64.high %v629_v42, %v628_v49, %v1516_v39  ;;  %v1522_v20 = vsel %vm141_vm11, nan, %v1468_v11 }
  0x97   :  { %v417_v24 = vadd.s32 %v1320_v12, %v1339_v47  ;;  %v437_v38 = vsub.s32 4294967266, %v1503_v52  ;;  %v956_v7 = vadd.s32 4294967169, %v689_v43  ;;  %v251_v18 = vsel %vm249_vm12, %v1439_v17, %v250_v30 }
  0x98   :  { %v254_v37 = vsel %vm252_vm14, %v253_v62, %v1015_v14  ;;  %v1535_v29 = vmul.f32 0.0031104386, %v1470_v9  ;;  %v949_v21 = vmin.u32 %v543_v2, %v1505_v32  ;;  %v342_v12 = vsel %vm259_vm13, %v341_v60, %v1481_v13 }
  0x99   :  { %v636_v47 = vmul.u32 %v629_v42, %v620_v28  ;;  %v639_v11 = vadd.s32 1, %v1511_v58  ;;  %v695_v44 = vadd.s32 1, %v956_v7  ;;  %vm1544_vm6 = vcmp.le.f32.partialorder %v477_v63, 0.7853982 }
  0x9a   :  { %vm479_vm7 = vcmp.lt.s32.totalorder %v1350_v48, 0  ;;  %v545_v9 = vclz %v949_v21  ;;  %v563_v62 = vsub.s32 4, %v539_v46  ;;  %v1551_v14 = vsel %vm248_vm2, %v251_v18, %v254_v37 }
  0x9b   :  { %v433_v13 = vsub.s32 32, %v1503_v52  ;;  %v1554_v6 = vadd.s32 127, %v437_v38  ;;  %vm638_vm13 = vc.u32 %v1517_v40, %v1510_v3  ;;  %v1561_v63 = vsel %vm1376_vm15, %v1139_v23, %v342_v12 }
  0x9c   :  { %v950_v35 = vadd.s32 4294967294, %v545_v9  ;;  %v640_v56 = vsel %vm638_vm13, %v639_v11, %v1511_v58  ;;  %vm696_vm8 = vcmp.gt.s32.totalorder %v695_v44, 0  ;;  %v434_v45 = vshll.u32 %v1425_v4, %v1503_v52 }
  0x9d   :  { %v641_v42 = vadd.s32 %v640_v56, %v636_v47  ;;  %v685_v16 = vand.u32 2147483647, %v1472_v15  ;;  %v697_v26 = vsel %vm696_vm8, %v695_v44, 0  ;;  %v533_v33 = vadd.s32 %v1461_v34, %v1457_v8 }
  0x9e   :  { %vm951_vm9 = vcmp.lt.s32.totalorder %v950_v35, 0  ;;  %v564_v0 = vsel %vm479_vm7, %v563_v62, %v539_v46  ;;  %v699_v25 = vand.u32 31, %v697_v26  ;;  %v1571_v50 = vshrl.u32 %v417_v24, %v433_v13 }
  0x9f   :  { %v439_v36 = vshll.u32 %v1554_v6, 23  ;;  %v548_v41 = vsel %vm951_vm9, 0, %v950_v35  ;;  %v642_v43 = vadd.s32 536870912, %v641_v42  ;;  %v566_v58 = vsel %vm1544_vm6, 0, %v564_v0 }
  0xa0   :  { %v549_v30 = vsub.s32 32, %v548_v41  ;;  %v550_v19 = vshll.u32 %v1505_v32, %v548_v41  ;;  %v553_v60 = vsub.s32 4294967266, %v548_v41  ;;  %v700_v49 = vsub.s32 32, %v699_v25 }
  0xa1   :  { %v643_v8 = vshrl.u32 %v642_v43, 30  ;;  %v692_v34 = vand.u32 8388607, %v685_v16  ;;  %v1579_v46 = vshrl.u32 %v697_v26, 5  ;;  %v702_v39 = vshll.u32 %v1097_v53, %v699_v25 }
  0xa2   :  { %v551_v2 = vshrl.u32 %v533_v33, %v549_v30  ;;  %v554_v28 = vadd.s32 127, %v553_v60  ;;  %v703_v24 = vshrl.u32 %v1098_v55, %v700_v49  ;;  %v705_v32 = vshll.u32 %v1098_v55, %v699_v25 }
  0xa3   :  { %v644_v38 = vshll.u32 %v643_v8, 30  ;;  %v706_v7 = vshrl.u32 %v1099_v57, %v700_v49  ;;  %v708_v18 = vshll.u32 %v1099_v57, %v699_v25  ;;  %vm583_vm15 = vcmp.lt.s32.totalorder %v1388_v27, 0 }
  0xa4   :  { %v552_v37 = vor.u32 %v551_v2, %v550_v19  ;;  %v555_v21 = vshll.u32 %v554_v28, 23  ;;  %v709_v12 = vshrl.u32 %v1100_v59, %v700_v49  ;;  %v711_v47 = vshll.u32 %v1100_v59, %v699_v25 }
  0xa5   :  { %v1589_v11 = vadd.s32 3, %v566_v58  ;;  %v637_v44 = vadd.s32 %v1510_v3, %v1517_v40  ;;  %v1593_v9 = vsub.s32 %v641_v42, %v644_v38  ;;  %v693_v62 = vor.u32 8388608, %v692_v34 }
  0xa6   :  { %v556_v13 = vor.u32 4788187, %v555_v21  ;;  %v559_v35 = vcvt.s32.f32 %v552_v37  ;;  %v704_v56 = vor.u32 %v703_v24, %v702_v39  ;;  %v712_v26 = vshrl.u32 %v1101_v61, %v700_v49 }
  0xa7   :  { %v647_v33 = vsub.s32 0, %v1593_v9  ;;  %v707_v0 = vor.u32 %v706_v7, %v705_v32  ;;  %v714_v41 = vshll.u32 %v1101_v61, %v699_v25  ;;  %v715_v43 = vshrl.u32 %v1102_v5, %v700_v49 }
  0xa8   :  { %v557_v30 = vand.u32 2147483647, %v556_v13  ;;  %v710_v19 = vor.u32 %v709_v12, %v708_v18  ;;  %v713_v60 = vor.u32 %v712_v26, %v711_v47  ;;  %vm717_vm10 = vcmp.lt.s32.totalorder %v1579_v46, 1 }
  0xa9   :  { %v953_v3 = vmin.u32 %v647_v33, %v1593_v9  ;;  %v667_v40 = vsub.s32 4, %v643_v8  ;;  %v716_v42 = vor.u32 %v715_v43, %v714_v41  ;;  %v1601_v58 = vshll.u32 %v693_v62, 8 }
  0xaa   :  { %v560_v34 = vmul.f32 %v559_v35, %v557_v30  ;;  %v701_v2 = vshrl.u32 %v1097_v53, %v700_v49  ;;  %vm719_vm11 = vcmp.lt.s32.totalorder %v1579_v46, 3  ;;  %vm720_vm12 = vcmp.lt.s32.totalorder %v1579_v46, 4 }
  0xab   :  { %v649_v25 = vclz %v953_v3  ;;  %vm718_vm14 = vcmp.lt.s32.totalorder %v1579_v46, 2  ;;  %v725_v28 = vsel %vm717_vm10, %v704_v56, %v707_v0  ;;  %v792_v39 = vand.u32 2139095040, %v1535_v29 }
  0xac   :  { %vm245_vm0 = vweird.f32 %v1136_v22  ;;  %v561_v24 = vxor.u32 2147483648, %v560_v34  ;;  %v722_v38 = vsel %vm720_vm12, %v710_v19, 2102212464  ;;  %v726_v32 = vsel %vm720_vm12, %v713_v60, 920167782 }
  0xad   :  { %v729_v49 = vsel %vm717_vm10, %v707_v0, %v710_v19  ;;  %v954_v7 = vadd.s32 4294967294, %v649_v25  ;;  %v668_v18 = vsel %vm583_vm15, %v667_v40, %v643_v8  ;;  %v727_v37 = vsel %vm719_vm11, %v710_v19, %v726_v32 }
  0xae   :  { %v730_v21 = vsel %vm720_vm12, %v716_v42, 1326507024  ;;  %v562_v12 = vsel %vm479_vm7, %v561_v24, %v560_v34  ;;  %v721_v47 = vsel %vm717_vm10, %v701_v2, %v704_v56  ;;  %v723_v62 = vsel %vm719_vm11, %v707_v0, %v722_v38 }
  0xaf   :  { %v731_v13 = vsel %vm719_vm11, %v713_v60, %v730_v21  ;;  %v565_v8 = vsel %vm1544_vm6, %v1350_v48, %v562_v12  ;;  %vm955_vm1 = vcmp.lt.s32.totalorder %v954_v7, 0  ;;  %v728_v35 = vsel %vm718_vm14, %v725_v28, %v727_v37 }
  0xb0   :  { %v732_v26 = vsel %vm718_vm14, %v729_v49, %v731_v13  ;;  %1016 = vcosq.f32 %v565_v8  ;;  %v652_v33 = vsel %vm955_vm1, 0, %v954_v7  ;;  %v724_v17 = vsel %vm718_vm14, %v721_v47, %v723_v62 }
  0xb1   :  { %v1633_v56 = vmul.u32.u64.low %v1601_v58, %v732_v26  ;;  %v1634_v41 = vmul.u32.u64.high %v1601_v58, %v732_v26, %v1633_v56  ;;  %1018 = vsinq.f32 %v565_v8  ;;  %v653_v0 = vsub.s32 32, %v652_v33 }
  0xb2   :  { %v654_v43 = vshll.u32 %v1593_v9, %v652_v33  ;;  %v657_v30 = vsub.s32 4294967266, %v652_v33  ;;  %v1640_v19 = vmul.u32.u64.low %v1601_v58, %v728_v35  ;;  %v1641_v60 = vmul.u32.u64.high %v1601_v58, %v728_v35, %v1640_v19 }
  0xb3   :  { %v793_v3 = vshrl.u32 %v792_v39, 23  ;;  %1020 = vcosq.f32 %v1561_v63  ;;  %vm1647_vm2 = vcmp.le.f32.partialorder %v581_v10, 0.7853982  ;;  %v655_v42 = vshrl.u32 %v637_v44, %v653_v0 }
  0xb4   :  { %v658_v9 = vadd.s32 127, %v657_v30  ;;  %v1655_v46 = vor.u32 %v1571_v50, %v434_v45  ;;  %v670_v34 = vsel %vm1647_vm2, 0, %v668_v18  ;;  %v789_v2 = vand.u32 2147483647, %v1535_v29 }
  0xb5   :  { %v960_v25 = vadd.s32 4294967169, %v793_v3  ;;  %v656_v28 = vor.u32 %v655_v42, %v654_v43  ;;  %v740_v10 = vmul.u32 %v1601_v58, %v724_v17  ;;  %vm742_vm3 = vc.u32 %v1634_v41, %v1640_v19 }
  0xb6   :  { %v659_v39 = vshll.u32 %v658_v9, 23  ;;  %v1665_v44 = vor.u32 4788187, %v439_v36  ;;  %v571_v4 = vand.u32 3, %v1589_v11  ;;  %v743_v52 = vadd.s32 1, %v1641_v60 }
  0xb7   :  { %v799_v45 = vadd.s32 1, %v960_v25  ;;  %v256_v50 = vsel %vm245_vm0, nan, %v1551_v14  ;;  %1022 = vsinq.f32 %v1561_v63  ;;  %v663_v58 = vcvt.s32.f32 %v656_v28 }
  0xb8   :  { %v660_v24 = vor.u32 4788187, %v659_v39  ;;  %v443_v38 = vcvt.s32.f32 %v1655_v46  ;;  %v674_v32 = vadd.s32 3, %v670_v34  ;;  %v744_v6 = vsel %vm742_vm3, %v743_v52, %v1641_v60 }
  0xb9   :  { %vm800_vm4 = vcmp.gt.s32.totalorder %v799_v45, 0  ;;  %v745_v49 = vadd.s32 %v744_v6, %v740_v10  ;;  %v796_v11 = vand.u32 8388607, %v789_v2  ;;  %v441_v22 = vand.u32 2147483647, %v1665_v44 }
  0xba   :  { %v661_v36 = vand.u32 2147483647, %v660_v24  ;;  %v801_v7 = vsel %vm800_vm4, %v799_v45, 0  ;;  %v1017_v18 = vpop.eup %1016  ;;  %vm572_vm5 = vcmp.lt.s32.totalorder %v571_v4, 2  ;;  %vm573_vm6 = vcmp.eq.s32.totalorder %v571_v4, 0 }
  0xbb   :  { %v803_v14 = vand.u32 31, %v801_v7  ;;  %v1019_v63 = vpop.eup %1018  ;;  %vm569_vm7 = vweird.f32 %v1350_v48  ;;  %vm576_vm13 = vcmp.eq.s32.totalorder %v571_v4, 2  ;;  %v577_v37 = vxor.u32 2147483648, %v1017_v18 }
  0xbc   :  { %v664_v21 = vmul.f32 %v663_v58, %v661_v36  ;;  %v746_v12 = vadd.s32 536870912, %v745_v49  ;;  %v574_v47 = vxor.u32 2147483648, %v1019_v63  ;;  %v1679_v62 = vand.u32 3, %v674_v32 }
  0xbd   :  { %v804_v13 = vsub.s32 32, %v803_v14  ;;  %v897_v8 = vmul.f32 %v1522_v20, %v1522_v20  ;;  %v1683_v35 = vpop.eup %1020  ;;  %v797_v56 = vor.u32 8388608, %v796_v11  ;;  %v898_v0 = vmul.f32 %v256_v50, %v256_v50 }
  0xbe   :  { %v665_v26 = vxor.u32 2147483648, %v664_v21  ;;  %v1685_v33 = vshrl.u32 %v746_v12, 30  ;;  %v575_v43 = vsel %vm573_vm6, %v1017_v18, %v574_v47  ;;  %v578_v30 = vsel %vm576_vm13, %v577_v37, %v1019_v63 }
  0xbf   :  { %v806_v17 = vshll.u32 %v1097_v53, %v803_v14  ;;  %v809_v60 = vshll.u32 %v1098_v55, %v803_v14  ;;  %v807_v20 = vshrl.u32 %v1098_v55, %v804_v13  ;;  %v810_v9 = vshrl.u32 %v1099_v57, %v804_v13 }
  0xc0   :  { %v666_v3 = vsel %vm583_vm15, %v665_v26, %v664_v21  ;;  %v748_v42 = vshll.u32 %v1685_v33, 30  ;;  %v802_v25 = vshrl.u32 %v801_v7, 5  ;;  %v812_v28 = vshll.u32 %v1099_v57, %v803_v14 }
  0xc1   :  { %v669_v34 = vsel %vm1647_vm2, %v1388_v27, %v666_v3  ;;  %1024 = vrcp.f32 %v897_v8  ;;  %v1699_v39 = vpop.eup %1022  ;;  %v805_v52 = vshrl.u32 %v1097_v53, %v804_v13  ;;  %v813_v45 = vshrl.u32 %v1100_v59, %v804_v13 }
  0xc2   :  { %1026 = vcosq.f32 %v669_v34  ;;  %v1701_v10 = vsub.s32 %v745_v49, %v748_v42  ;;  %v579_v55 = vsel %vm572_vm5, %v575_v43, %v578_v30  ;;  %v815_v50 = vshll.u32 %v1100_v59, %v803_v14 }
  0xc3   :  { %1028 = vsinq.f32 %v669_v34  ;;  %v816_v40 = vshrl.u32 %v1101_v61, %v804_v13  ;;  %v808_v57 = vor.u32 %v807_v20, %v806_v17  ;;  %v811_v58 = vor.u32 %v810_v9, %v809_v60 }
  0xc4   :  { %v751_v24 = vsub.s32 0, %v1701_v10  ;;  %v818_v32 = vshll.u32 %v1101_v61, %v803_v14  ;;  %vm677_vm8 = vcmp.eq.s32.totalorder %v1679_v62, 0  ;;  %v814_v6 = vor.u32 %v813_v45, %v812_v28 }
  0xc5   :  { %v817_v36 = vor.u32 %v816_v40, %v815_v50  ;;  %v819_v53 = vshrl.u32 %v1102_v5, %v804_v13  ;;  %vm821_vm9 = vcmp.lt.s32.totalorder %v802_v25, 1  ;;  %vm676_vm15 = vcmp.lt.s32.totalorder %v1679_v62, 2 }
  0xc6   :  { %v957_v4 = vmin.u32 %v751_v24, %v1701_v10  ;;  %vm824_vm10 = vcmp.lt.s32.totalorder %v802_v25, 4  ;;  %v1714_v59 = vshll.u32 %v797_v56, 8  ;;  %1030 = vrcp.f32 %v898_v0 }
  0xc7   :  { %v580_v49 = vsel %vm569_vm7, nan, %v579_v55  ;;  %v820_v11 = vor.u32 %v819_v53, %v818_v32  ;;  %vm823_vm11 = vcmp.lt.s32.totalorder %v802_v25, 3  ;;  %v826_v61 = vsel %vm824_vm10, %v814_v6, 2102212464 }
  0xc8   :  { %v753_v7 = vclz %v957_v4  ;;  %vm822_vm12 = vcmp.lt.s32.totalorder %v802_v25, 2  ;;  %v825_v18 = vsel %vm821_vm9, %v805_v52, %v808_v57  ;;  %v829_v5 = vsel %vm821_vm9, %v808_v57, %v811_v58 }
  0xc9   :  { %v827_v14 = vsel %vm823_vm11, %v811_v58, %v826_v61  ;;  %v830_v63 = vsel %vm824_vm10, %v817_v36, 920167782  ;;  %v833_v37 = vsel %vm821_vm9, %v811_v58, %v814_v6  ;;  %v834_v21 = vsel %vm824_vm10, %v820_v11, 1326507024 }
  0xca   :  { %vm356_vm14 = vcmp.eq.s32.totalorder %v1411_v54, 2  ;;  %vm680_vm0 = vcmp.eq.s32.totalorder %v1679_v62, 2  ;;  %v958_v48 = vadd.s32 4294967294, %v753_v7  ;;  %v831_v12 = vsel %vm823_vm11, %v814_v6, %v830_v63 }
  0xcb   :  { %v835_v47 = vsel %vm823_vm11, %v817_v36, %v834_v21  ;;  %v1025_v13 = vpop.eup %1024  ;;  %v741_v8 = vadd.s32 %v1640_v19, %v1634_v41  ;;  %v832_v26 = vsel %vm822_vm12, %v829_v5, %v831_v12  ;;  %v893_v0 = vmul.f32 0.0031104335, %v580_v49 }
  0xcc   :  { %v836_v56 = vsel %vm822_vm12, %v833_v37, %v835_v47  ;;  %v1027_v43 = vpop.eup %1026  ;;  %vm959_vm1 = vcmp.lt.s32.totalorder %v958_v48, 0  ;;  %v828_v30 = vsel %vm822_vm12, %v825_v18, %v827_v14  ;;  %v444_v25 = vmul.f32 %v443_v38, %v441_v22 }
  0xcd   :  { %v1729_v17 = vmul.u32.u64.low %v1714_v59, %v836_v56  ;;  %v1730_v60 = vmul.u32.u64.high %v1714_v59, %v836_v56, %v1729_v17  ;;  %v1029_v3 = vpop.eup %1028  ;;  %v681_v42 = vxor.u32 2147483648, %v1027_v43  ;;  %v756_v20 = vsel %vm959_vm1, 0, %v958_v48 }
  0xce   :  { %v1733_v9 = vmul.u32.u64.low %v1714_v59, %v832_v26  ;;  %v1734_v34 = vmul.u32.u64.high %v1714_v59, %v832_v26, %v1733_v9  ;;  %v678_v41 = vxor.u32 2147483648, %v1029_v3  ;;  %v757_v19 = vsub.s32 32, %v756_v20 }
  0xcf   :  { %v758_v28 = vshll.u32 %v1701_v10, %v756_v20  ;;  %v761_v52 = vsub.s32 4294967266, %v756_v20  ;;  %vm673_vm2 = vweird.f32 %v1388_v27  ;;  %v682_v45 = vsel %vm680_vm0, %v681_v42, %v1029_v3 }
  0xd0   :  { %v902_v55 = vmul.f32 %v1025_v13, %v893_v0  ;;  %v1031_v50 = vpop.eup %1030  ;;  %v679_v40 = vsel %vm677_vm8, %v1027_v43, %v678_v41  ;;  %v759_v24 = vshrl.u32 %v741_v8, %v757_v19  ;;  %v844_v10 = vmul.u32 %v1714_v59, %v828_v30 }
  0xd1   :  { %v762_v57 = vadd.s32 127, %v761_v52  ;;  %v357_v58 = vxor.u32 2147483648, %v1683_v35  ;;  %v683_v46 = vsel %vm676_vm15, %v679_v40, %v682_v45  ;;  %vm846_vm3 = vc.u32 %v1730_v60, %v1733_v9 }
  0xd2   :  { %v847_v27 = vadd.s32 1, %v1734_v34  ;;  %909 = vst [vmem:[#allocation5] sm:$0xff] %v902_v55  ;;  %v354_v44 = vxor.u32 2147483648, %v1699_v39  ;;  %v684_v38 = vsel %vm673_vm2, nan, %v683_v46  ;;  %v760_v22 = vor.u32 %v759_v24, %v758_v28 }
  0xd3   :  { %v763_v32 = vshll.u32 %v762_v57, 23  ;;  %vm353_vm4 = vcmp.eq.s32.totalorder %v1411_v54, 0  ;;  %v445_v6 = vxor.u32 2147483648, %v444_v25  ;;  %v894_v53 = vmul.f32 0.0031104335, %v684_v38 }
  0xd4   :  { %v848_v36 = vsel %vm846_vm3, %v847_v27, %v1734_v34  ;;  %vm363_vm5 = vcmp.lt.s32.totalorder %v1228_v31, 0  ;;  %v767_v4 = vcvt.s32.f32 %v760_v22  ;;  %vm352_vm6 = vcmp.lt.s32.totalorder %v1411_v54, 2 }
  0xd5   :  { %v764_v62 = vor.u32 4788187, %v763_v32  ;;  %v849_v59 = vadd.s32 %v848_v36, %v844_v10  ;;  %v358_v49 = vsel %vm356_vm14, %v357_v58, %v1699_v39  ;;  %v904_v11 = vmul.f32 %v1031_v50, %v894_v53 }
  0xd6   :  { %v355_v61 = vsel %vm353_vm4, %v1683_v35, %v354_v44  ;;  %v771_v18 = vsub.s32 4, %v1685_v33  ;;  %vm1766_vm7 = vcmp.le.f32.partialorder %v361_v1, 0.7853982  ;;  %v446_v63 = vsel %vm363_vm5, %v445_v6, %v444_v25 }
  0xd7   :  { %v765_v7 = vand.u32 2147483647, %v764_v62  ;;  %v850_v5 = vadd.s32 536870912, %v849_v59  ;;  %910 = vst [vmem:[#allocation5 + $0x8] sm:$0xff] %v904_v11  ;;  %vm349_vm13 = vweird.f32 %v1139_v23  ;;  %v359_v35 = vsel %vm352_vm6, %v355_v61, %v358_v49 }
  0xd8   :  { %vm1777_vm8 = vcmp.le.f32.partialorder %v685_v16, 0.7853982  ;;  %vm687_vm9 = vcmp.lt.s32.totalorder %v1472_v15, 0  ;;  %v449_v1 = vsel %vm1766_vm7, %v1228_v31, %v446_v63  ;;  %v447_v23 = vsub.s32 4, %v1390_v51 }
  0xd9   :  { %v768_v37 = vmul.f32 %v767_v4, %v765_v7  ;;  %v1772_v54 = vshrl.u32 %v850_v5, 30  ;;  %v772_v48 = vsel %vm687_vm9, %v771_v18, %v1685_v33  ;;  %v360_v8 = vsel %vm349_vm13, nan, %v359_v35 }
  0xda   :  { %1032 = vcosq.f32 %v449_v1  ;;  %v774_v26 = vsel %vm1777_vm8, 0, %v772_v48  ;;  %v448_v33 = vsel %vm363_vm5, %v447_v23, %v1390_v51  ;;  %v899_v30 = vmul.f32 %v360_v8, %v360_v8 }
  0xdb   :  { %v769_v21 = vxor.u32 2147483648, %v768_v37  ;;  %v852_v12 = vshll.u32 %v1772_v54, 30  ;;  %v778_v0 = vadd.s32 3, %v774_v26  ;;  %v450_v17 = vsel %vm1766_vm7, 0, %v448_v33 }
  0xdc   :  { %v454_v34 = vadd.s32 3, %v450_v17  ;;  %v845_v41 = vadd.s32 %v1733_v9, %v1730_v60  ;;  %vm777_vm14 = vweird.f32 %v1472_v15  ;;  %vm453_vm3 = vweird.f32 %v1228_v31 }
  0xdd   :  { %v770_v47 = vsel %vm687_vm9, %v769_v21, %v768_v37  ;;  %v853_v13 = vsub.s32 %v849_v59, %v852_v12  ;;  %v779_v42 = vand.u32 3, %v778_v0  ;;  %v875_v59 = vsub.s32 4, %v1772_v54 }
  0xde   :  { %v773_v16 = vsel %vm1777_vm8, %v1472_v15, %v770_v47  ;;  %v455_v50 = vand.u32 3, %v454_v34  ;;  %vm791_vm4 = vcmp.lt.s32.totalorder %v1535_v29, 0  ;;  %vm790_vm5 = vcmp.le.f32.partialorder %v789_v2, 0.7853982 }
  0xdf   :  { %1034 = vcosq.f32 %v773_v16  ;;  %v855_v56 = vsub.s32 0, %v853_v13  ;;  %vm784_vm10 = vcmp.eq.s32.totalorder %v779_v42, 2  ;;  %vm781_vm11 = vcmp.eq.s32.totalorder %v779_v42, 0 }
  0xe0   :  { %1036 = vsinq.f32 %v773_v16  ;;  %vm780_vm12 = vcmp.lt.s32.totalorder %v779_v42, 2  ;;  %vm457_vm0 = vcmp.eq.s32.totalorder %v455_v50, 0  ;;  %vm460_vm1 = vcmp.eq.s32.totalorder %v455_v50, 2 }
  0xe1   :  { %1038 = vsinq.f32 %v449_v1  ;;  %v961_v43 = vmin.u32 %v855_v56, %v853_v13  ;;  %vm456_vm2 = vcmp.lt.s32.totalorder %v455_v50, 2  ;;  %v876_v5 = vsel %vm791_vm4, %v875_v59, %v1772_v54 }
  0xe2   :  { %1040 = vrcp.f32 %v899_v30  ;;  %v878_v35 = vsel %vm790_vm5, 0, %v876_v5  ;;  %vm881_vm8 = vweird.f32 %v1535_v29 }
  0xe3   :  { %v857_v3 = vclz %v961_v43  ;;  %v882_v39 = vadd.s32 3, %v878_v35 }
  0xe4   :  { %v1033_v19 = vpop.eup %1032 }
  0xe5   :  { %v962_v20 = vadd.s32 4294967294, %v857_v3  ;;  %v461_v38 = vxor.u32 2147483648, %v1033_v19  ;;  %v883_v31 = vand.u32 3, %v882_v39 }
  0xe7   :  { %vm963_vm15 = vcmp.lt.s32.totalorder %v962_v20, 0  ;;  %vm888_vm6 = vcmp.eq.s32.totalorder %v883_v31, 2  ;;  %vm885_vm7 = vcmp.eq.s32.totalorder %v883_v31, 0  ;;  %vm884_vm13 = vcmp.lt.s32.totalorder %v883_v31, 2 }
  0xe8   :  { %v860_v28 = vsel %vm963_vm15, 0, %v962_v20 }
  0xe9   :  { %v1035_v51 = vpop.eup %1034  ;;  %v861_v52 = vsub.s32 32, %v860_v28  ;;  %v862_v25 = vshll.u32 %v853_v13, %v860_v28  ;;  %v865_v45 = vsub.s32 4294967266, %v860_v28 }
  0xea   :  { %v1037_v55 = vpop.eup %1036  ;;  %v785_v40 = vxor.u32 2147483648, %v1035_v51 }
  0xeb   :  { %v1039_v24 = vpop.eup %1038  ;;  %v782_v57 = vxor.u32 2147483648, %v1037_v55  ;;  %v863_v10 = vshrl.u32 %v845_v41, %v861_v52  ;;  %v866_v58 = vadd.s32 127, %v865_v45 }
  0xec   :  { %v786_v60 = vsel %vm784_vm10, %v785_v40, %v1037_v55  ;;  %v458_v44 = vxor.u32 2147483648, %v1039_v24  ;;  %v1041_v32 = vpop.eup %1040  ;;  %v462_v15 = vsel %vm460_vm1, %v461_v38, %v1039_v24 }
  0xed   :  { %v783_v9 = vsel %vm781_vm11, %v1035_v51, %v782_v57  ;;  %v864_v46 = vor.u32 %v863_v10, %v862_v25  ;;  %v867_v27 = vshll.u32 %v866_v58, 23 }
  0xee   :  { %v787_v22 = vsel %vm780_vm12, %v783_v9, %v786_v60  ;;  %v459_v49 = vsel %vm457_vm0, %v1033_v19, %v458_v44 }
  0xef   :  { %v788_v6 = vsel %vm777_vm14, nan, %v787_v22  ;;  %v868_v36 = vor.u32 4788187, %v867_v27  ;;  %v871_v53 = vcvt.s32.f32 %v864_v46  ;;  %v463_v7 = vsel %vm456_vm2, %v459_v49, %v462_v15 }
  0xf0   :  { %v895_v62 = vmul.f32 0.0031104335, %v788_v6  ;;  %v464_v63 = vsel %vm453_vm3, nan, %v463_v7 }
  0xf1   :  { %v869_v4 = vand.u32 2147483647, %v868_v36  ;;  %v900_v1 = vmul.f32 %v464_v63, %v464_v63 }
  0xf2   :  { %v906_v11 = vmul.f32 %v1041_v32, %v895_v62 }
  0xf3   :  { %v872_v61 = vmul.f32 %v871_v53, %v869_v4 }
  0xf4   :  { %911 = vst [vmem:[#allocation5 + $0x10] sm:$0xff] %v906_v11 }
  0xf5   :  { %v873_v18 = vxor.u32 2147483648, %v872_v61 }
  0xf7   :  { %v874_v14 = vsel %vm791_vm4, %v873_v18, %v872_v61 }
  0xf8   :  { %v877_v37 = vsel %vm790_vm5, %v1535_v29, %v874_v14 }
  0xf9   :  { %1042 = vcosq.f32 %v877_v37 }
  0xfa   :  { %1044 = vsinq.f32 %v877_v37 }
  0xfb   :  { %1046 = vrcp.f32 %v900_v1 }
 0x103   :  { %v1043_v21 = vpop.eup %1042 }
 0x104   :  { %v1045_v48 = vpop.eup %1044  ;;  %v889_v12 = vxor.u32 2147483648, %v1043_v21 }
 0x105   :  { %v886_v2 = vxor.u32 2147483648, %v1045_v48  ;;  %v1047_v13 = vpop.eup %1046 }
 0x106   :  { %v890_v54 = vsel %vm888_vm6, %v889_v12, %v1045_v48 }
 0x107   :  { %v887_v23 = vsel %vm885_vm7, %v1043_v21, %v886_v2 }
 0x108   :  { %v891_v47 = vsel %vm884_vm13, %v887_v23, %v890_v54 }
 0x109   :  { %v892_v8 = vsel %vm881_vm8, nan, %v891_v47 }
 0x10a   :  { %v896_v16 = vmul.f32 0.0031104335, %v892_v8 }
 0x10c   :  { %v908_v26 = vmul.f32 %v1047_v13, %v896_v16 }
 0x10e   :  { %912 = vst [vmem:[#allocation5 + $0x18] sm:$0xff] %v908_v26 }
 0x10f   :  { %1081 = shalt.err (!%p1078_p12)
}
 0x110   :  { %s1082_s22 = scalar_lea.hbm %s1822_s1, 512 }
 0x111   :  { %p1083_p13 = scmp.ne.s32.totalorder %s1822_s1, %s1082_s22  ;;  %p1086_p0 = scmp.lt.u32.totalorder %s1082_s22, %s1822_s1 }
 0x113   :  { %p1088_p1 = pnand %p1086_p0, %p1083_p13 }
 0x115   :  { %1091 = shalt.err (!%p1088_p1)
}
 0x116   :  { %922 = dma.vmem_to_hbm [thread:$0]  %s920_s18, 512, %s1822_s1, [#allocation4]  }
 0x117   :  { %1094 = dma.done.wait [#allocation4], 512  }
 0x118   :  { %1095 = vsyncadd [#allocation4], 4294966784 }
 0x119   :  { %926 = vsyncpa [#allocation3], 1 }
 0x11a   :  { %927 = vsyncpa [#allocation4], 1 }

</bundles_post_ra>
